<compile_context>
chip_gen: v5e
topology: v5e:2x2
jax: 0.10.0
libtpu: 0.0.40
codegen_flags: <defaults>
</compile_context>

<pallas_src>
import functools
import math

import jax
import jax.numpy as jnp
from jax.experimental import pallas as pl
from jax.experimental.pallas import tpu as pltpu


# ---------------------------------------------------------------------------
# Parameter setup (mirrors AliBi.__init__ / _get_slopes)
# ---------------------------------------------------------------------------
def _get_slopes(n):
    def power_of_2(m):
        start = 2 ** (-(2 ** (-(math.log2(m) - 3))))
        ratio = start
        return [start * ratio ** i for i in range(m)]

    if math.log2(n).is_integer():
        return power_of_2(n)
    closest = 2 ** math.floor(math.log2(n))
    return power_of_2(closest) + _get_slopes(2 * closest)[0::2][: n - closest]


def make_alibi_slopes(num_heads, mp_size=1, mp_rank=0):
    # NOTE: mp_rank is 0-based here (the module's default mp_rank=1 with
    # mp_size=1 would yield an empty slice, which is clearly unintended usage).
    assert mp_size <= num_heads and mp_rank < mp_size
    slice_size = num_heads // mp_size
    all_slopes = _get_slopes(num_heads)
    sliced = all_slopes[mp_rank * slice_size : (mp_rank + 1) * slice_size]
    return jnp.asarray(sliced, dtype=jnp.float32)


# ---------------------------------------------------------------------------
# Tiling heuristics
# ---------------------------------------------------------------------------
def _sublane(itemsize):
    return {4: 8, 2: 16, 1: 32}.get(itemsize, 8)


def _target_tile_bytes():
    """Per-generation tile-size target (pipeline block bytes)."""
    try:
        kind = jax.devices()[0].device_kind.lower()
    except Exception:
        kind = ""
    if "v5 lite" in kind or "v5lite" in kind or "v5e" in kind:
        return 1 << 20   # v5e: 16 MiB scoped-VMEM default -> keep footprint small
    if "v6" in kind or "trillium" in kind or "v7" in kind or "7x" in kind:
        return 4 << 20   # v6e/v7x: faster HBM -> amortize ~0.35 us/step overhead
    return 2 << 20


def _largest_divisor(n, limit, multiple=1):
    """Largest d with n % d == 0, d <= limit, d % multiple == 0 (or None)."""
    best = None
    for d in range(1, min(n, limit) + 1):
        if n % d == 0 and d % multiple == 0:
            best = d
    return best


def _choose_tiling(num_heads, seq_q, seq_k, itemsize, target_bytes):
    """Pick (h_blk, tq). Fold heads when a whole (Sq, Sk) slab is small;
    otherwise tile the query axis (sublane-aligned; cdiv grid if needed)."""
    sub = _sublane(itemsize)
    row_bytes = seq_k * itemsize
    slab_bytes = seq_q * row_bytes
    if slab_bytes <= target_bytes:
        h_blk = _largest_divisor(num_heads, max(1, target_bytes // slab_bytes)) or 1
        return h_blk, seq_q
    max_rows = max(1, target_bytes // row_bytes)
    tq = _largest_divisor(seq_q, max_rows, sub)
    if tq is None:
        # No sublane-aligned exact divisor: fixed sublane-multiple tq + cdiv grid
        # (last partial block is masked by Pallas) instead of a full-Sq slab.
        tq = (max_rows // sub) * sub
        if tq == 0:
            tq = min(sub, seq_q)
        tq = min(tq, seq_q)
    return 1, tq


def _choose_decode_rows(rows, seq_k, itemsize, target_bytes):
    sub = _sublane(itemsize)
    max_rows = max(1, target_bytes // max(1, seq_k * itemsize))
    if max_rows >= rows:
        return rows
    blk = (max_rows // sub) * sub
    return blk if blk > 0 else min(sub, rows)


def _vmem_limit(*byte_counts):
    need = sum(byte_counts)
    return int(min(max(need + (8 << 20), 16 << 20), 48 << 20))


# ---------------------------------------------------------------------------
# Training / prefill kernel (sq == sk): bias cached in VMEM across the batch
# ---------------------------------------------------------------------------
def _alibi_block_kernel(neg_slopes_ref, x_ref, o_ref, bias_ref, *, seq_q, h_blk):
    hb = pl.program_id(0)
    qb = pl.program_id(1)
    b = pl.program_id(2)
    tq, sk = x_ref.shape[1], x_ref.shape[2]

    @pl.when(b == 0)
    def _refill_bias_cache():
        # Global query row of local row i is q0 + i + (sk - seq_q): queries are
        # right-aligned against the key axis. max(diff, 0) zeroes the upper
        # triangle (no compare/select needed). Runs once per (hb, qb); reused
        # for every batch element.
        q0 = qb * tq + (sk - seq_q)
        diff = (
            jax.lax.broadcasted_iota(jnp.int32, (tq, sk), 0)
            - jax.lax.broadcasted_iota(jnp.int32, (tq, sk), 1)
            + q0
        )
        dist = jnp.maximum(diff, 0).astype(jnp.float32)            # (tq, sk) f32
        for h in range(h_blk):                                     # static unroll
            neg_slope = neg_slopes_ref[hb * h_blk + h]             # SMEM scalar
            bias_ref[h] = (neg_slope * dist).astype(bias_ref.dtype)

    # Steady state: pure load + add + store.
    o_ref[...] = x_ref[...] + bias_ref[...]


def _alibi_full(x, slopes):
    B, H, Sq, Sk = x.shape
    itemsize = jnp.dtype(x.dtype).itemsize
    target = _target_tile_bytes()
    h_blk, tq = _choose_tiling(H, Sq, Sk, itemsize, target)
    n_q = pl.cdiv(Sq, tq)
    grid = (H // h_blk, n_q, B)

    neg_slopes = (-slopes).astype(jnp.float32)          # pre-negated, lives in SMEM

    tile_bytes = h_blk * tq * Sk * itemsize
    cache_bytes = h_blk * tq * Sk * itemsize             # bias cache in x.dtype
    f32_tmp = 2 * tq * Sk * 4                             # dist + per-head product
    vmem_limit = _vmem_limit(4 * tile_bytes, cache_bytes, f32_tmp)

    elems = B * H * Sq * Sk
    cost = pl.CostEstimate(
        flops=2 * elems,                                  # bandwidth-bound add
        transcendentals=0,
        bytes_accessed=2 * elems * itemsize + H * 4,
    )

    kernel = functools.partial(_alibi_block_kernel, seq_q=Sq, h_blk=h_blk)
    return pl.pallas_call(
        kernel,
        out_shape=jax.ShapeDtypeStruct(x.shape, x.dtype),
        grid=grid,
        in_specs=[
            pl.BlockSpec(memory_space=pltpu.MemorySpace.SMEM),                  # slopes
            pl.BlockSpec((None, h_blk, tq, Sk), lambda hb, q, b: (b, hb, q, 0)),  # x
        ],
        out_specs=pl.BlockSpec((None, h_blk, tq, Sk), lambda hb, q, b: (b, hb, q, 0)),
        scratch_shapes=[pltpu.VMEM((h_blk, tq, Sk), x.dtype)],   # persistent bias cache
        compiler_params=pltpu.CompilerParams(
            # Batch (the cache-reuse axis) MUST be "arbitrary" so a megacore
            # split can never skip the b == 0 refill; hb/q stay "parallel".
            dimension_semantics=("parallel", "parallel", "arbitrary"),
            vmem_limit_bytes=vmem_limit,
        ),
        cost_estimate=cost,
        # x (input index 1) is a transient attention-score tensor: alias it to
        # the output (only saves HBM if the caller actually donates it).
        input_output_aliases={1: 0},
    )(neg_slopes, x)


# ---------------------------------------------------------------------------
# Decode kernel (sq == 1): B*H*Sq folded into the sublane axis
# ---------------------------------------------------------------------------
def _alibi_decode_kernel(x_ref, neg_slope_ref, o_ref):
    rows, sk = x_ref.shape
    col = jax.lax.broadcasted_iota(jnp.int32, (rows, sk), 1)
    dist = ((sk - 1) - col).astype(jnp.float32)          # distance to last key pos
    o_ref[...] = x_ref[...] + (neg_slope_ref[...] * dist).astype(x_ref.dtype)


def _alibi_decode(x, slopes):
    B, H, _, Sk = x.shape
    itemsize = jnp.dtype(x.dtype).itemsize
    rows = B * H
    rows_blk = _choose_decode_rows(rows, Sk, itemsize, _target_tile_bytes())

    x2 = x.reshape(rows, Sk)                              # sublane-dense 2D view
    neg_col = jnp.tile((-slopes).astype(jnp.float32), B).reshape(rows, 1)

    tile_bytes = rows_blk * Sk * itemsize
    vmem_limit = _vmem_limit(4 * tile_bytes, rows_blk * Sk * 4)

    out2 = pl.pallas_call(
        _alibi_decode_kernel,
        out_shape=jax.ShapeDtypeStruct((rows, Sk), x.dtype),
        grid=(pl.cdiv(rows, rows_blk),),
        in_specs=[
            pl.BlockSpec((rows_blk, Sk), lambda r: (r, 0)),
            pl.BlockSpec((rows_blk, 1), lambda r: (r, 0)),
        ],
        out_specs=pl.BlockSpec((rows_blk, Sk), lambda r: (r, 0)),
        compiler_params=pltpu.CompilerParams(
            dimension_semantics=("parallel",),
            vmem_limit_bytes=vmem_limit,
        ),
        input_output_aliases={0: 0},
    )(x2, neg_col)
    return out2.reshape(B, H, 1, Sk)


# ---------------------------------------------------------------------------
# Public forward
# ---------------------------------------------------------------------------
def alibi_forward(x, slopes):
    """x: [B, H, Sq, Sk]; slopes: [H] f32. Returns x + alibi_bias (dtype of x)."""
    assert x.ndim == 4
    B, H, Sq, Sk = x.shape
    assert slopes.shape == (H,)
    if Sq == Sk:
        return _alibi_full(x, slopes)
    assert Sq == 1, "sq == sk unless inference with cache (sq == 1)"
    return _alibi_decode(x, slopes)


# ---------------------------------------------------------------------------
# Pure-JAX reference (mirrors the PyTorch forward; no host-side cache needed)
# ---------------------------------------------------------------------------
def alibi_reference(x, slopes):
    sq, sk = x.shape[-2], x.shape[-1]
    i = jnp.arange(sk)[:, None]
    j = jnp.arange(sk)[None, :]
    a = -jnp.tril((i - j).astype(jnp.float32))                 # [sk, sk]
    a = a * slopes.astype(jnp.float32)[:, None, None]          # [H, sk, sk]
    if sq != sk:
        assert sq == 1, "sq == sk unless inference with cache (sq == 1)"
        a = a[:, sk - 1 : sk, :]
    return x + a[None].astype(x.dtype)


if __name__ == "__main__":
    # num_heads=8, mp_size=2, mp_rank=1  ->  slice_size=4 heads on this rank
    num_heads, mp_size, mp_rank = 8, 2, 1
    slopes = make_alibi_slopes(num_heads, mp_size, mp_rank)    # [4]

    B, H, S = 2, slopes.shape[0], 128
    key = jax.random.PRNGKey(0)
    k1, k2 = jax.random.split(key)

    # Training path: sq == sk (bias built once at b == 0, reused for b == 1).
    x = jax.random.normal(k1, (B, H, S, S), dtype=jnp.float32)
    ref = alibi_reference(x, slopes)
    out = jax.block_until_ready(alibi_forward(x, slopes))
    assert out.shape == ref.shape and out.dtype == ref.dtype
    assert jnp.allclose(out, ref, atol=1e-5, rtol=1e-5), "mismatch (sq == sk)"

    # Inference path: sq == 1 (single query at key position S - 1).
    x1 = jax.random.normal(k2, (B, H, 1, S), dtype=jnp.float32)
    ref1 = alibi_reference(x1, slopes)
    out1 = jax.block_until_ready(alibi_forward(x1, slopes))
    assert out1.shape == ref1.shape and out1.dtype == ref1.dtype
    assert jnp.allclose(out1, ref1, atol=1e-5, rtol=1e-5), "mismatch (sq == 1)"

    print("KERNEL_OK")
</pallas_src>

<mosaic_0001>
module attributes {stable_mosaic.version = 11 : i64} {
  func.func @_alibi_block_kernel(%arg0: i32, %arg1: i32, %arg2: i32, %arg3: memref<4xf32, #tpu.memory_space<smem>>, %arg4: memref<1x4x128x128xf32, #tpu.memory_space<vmem>>, %arg5: memref<1x4x128x128xf32, #tpu.memory_space<vmem>>, %arg6: memref<4x128x128xf32, #tpu.memory_space<vmem>>) attributes {dimension_semantics = [#tpu.dimension_semantics<parallel>, #tpu.dimension_semantics<parallel>, #tpu.dimension_semantics<arbitrary>], iteration_bounds = array<i64: 1, 1, 2>, scalar_prefetch = 0 : i64, scratch_operands = 1 : i64, tpu.core_type = #tpu.core_type<tc>, window_params = [{transform_indices = @transform_0, window_bounds = array<i64: 4>}, {transform_indices = @transform_1, window_bounds = array<i64: 1, 4, 128, 128>}, {transform_indices = @transform_2, window_bounds = array<i64: 1, 4, 128, 128>}]} {
    %c0_i32 = arith.constant 0 : i32
    %0 = arith.cmpi eq, %arg2, %c0_i32 : i32
    %1 = arith.extui %0 : i1 to i32
    %c0_i32_0 = arith.constant 0 : i32
    %2 = arith.cmpi ne, %1, %c0_i32_0 : i32
    scf.if %2 {
      %c128_i32 = arith.constant 128 : i32
      %10 = arith.muli %arg1, %c128_i32 : i32
      %c0_i32_11 = arith.constant 0 : i32
      %11 = arith.addi %10, %c0_i32_11 : i32
      %12 = tpu.iota {dimensions = array<i32: 0>} : vector<128x128xi32>
      %13 = tpu.iota {dimensions = array<i32: 1>} : vector<128x128xi32>
      %14 = arith.subi %12, %13 : vector<128x128xi32>
      %15 = vector.broadcast %11 : i32 to vector<128x128xi32>
      %16 = arith.addi %14, %15 : vector<128x128xi32>
      %c0_i32_12 = arith.constant 0 : i32
      %17 = vector.broadcast %c0_i32_12 : i32 to vector<128x128xi32>
      %18 = arith.maxsi %16, %17 : vector<128x128xi32>
      %19 = arith.sitofp %18 : vector<128x128xi32> to vector<128x128xf32>
      %c4_i32 = arith.constant 4 : i32
      %20 = arith.muli %arg0, %c4_i32 : i32
      %c0_i32_13 = arith.constant 0 : i32
      %21 = arith.addi %20, %c0_i32_13 : i32
      %22 = arith.index_cast %21 : i32 to index
      %23 = memref.load %arg3[%22] : memref<4xf32, #tpu.memory_space<smem>>
      %24 = vector.broadcast %23 : f32 to vector<128x128xf32>
      %25 = arith.mulf %24, %19 : vector<128x128xf32>
      %c0_14 = arith.constant 0 : index
      %c0_15 = arith.constant 0 : index
      %c0_16 = arith.constant 0 : index
      %26 = vector.load %arg6[%c0_14, %c0_15, %c0_16] : memref<4x128x128xf32, #tpu.memory_space<vmem>>, vector<1x128x128xf32>
      %27 = vector.shape_cast %26 : vector<1x128x128xf32> to vector<128x128xf32>
      %28 = vector.shape_cast %25 : vector<128x128xf32> to vector<1x128x128xf32>
      tpu.vector_store %arg6[%c0_14, %c0_15, %c0_16], %28 {strides = array<i32>} : memref<4x128x128xf32, #tpu.memory_space<vmem>>, vector<1x128x128xf32>,
      %c4_i32_17 = arith.constant 4 : i32
      %29 = arith.muli %arg0, %c4_i32_17 : i32
      %c1_i32 = arith.constant 1 : i32
      %30 = arith.addi %29, %c1_i32 : i32
      %31 = arith.index_cast %30 : i32 to index
      %32 = memref.load %arg3[%31] : memref<4xf32, #tpu.memory_space<smem>>
      %33 = vector.broadcast %32 : f32 to vector<128x128xf32>
      %34 = arith.mulf %33, %19 : vector<128x128xf32>
      %c1 = arith.constant 1 : index
      %c0_18 = arith.constant 0 : index
      %c0_19 = arith.constant 0 : index
      %35 = vector.load %arg6[%c1, %c0_18, %c0_19] : memref<4x128x128xf32, #tpu.memory_space<vmem>>, vector<1x128x128xf32>
      %36 = vector.shape_cast %35 : vector<1x128x128xf32> to vector<128x128xf32>
      %37 = vector.shape_cast %34 : vector<128x128xf32> to vector<1x128x128xf32>
      tpu.vector_store %arg6[%c1, %c0_18, %c0_19], %37 {strides = array<i32>} : memref<4x128x128xf32, #tpu.memory_space<vmem>>, vector<1x128x128xf32>,
      %c4_i32_20 = arith.constant 4 : i32
      %38 = arith.muli %arg0, %c4_i32_20 : i32
      %c2_i32 = arith.constant 2 : i32
      %39 = arith.addi %38, %c2_i32 : i32
      %40 = arith.index_cast %39 : i32 to index
      %41 = memref.load %arg3[%40] : memref<4xf32, #tpu.memory_space<smem>>
      %42 = vector.broadcast %41 : f32 to vector<128x128xf32>
      %43 = arith.mulf %42, %19 : vector<128x128xf32>
      %c2 = arith.constant 2 : index
      %c0_21 = arith.constant 0 : index
      %c0_22 = arith.constant 0 : index
      %44 = vector.load %arg6[%c2, %c0_21, %c0_22] : memref<4x128x128xf32, #tpu.memory_space<vmem>>, vector<1x128x128xf32>
      %45 = vector.shape_cast %44 : vector<1x128x128xf32> to vector<128x128xf32>
      %46 = vector.shape_cast %43 : vector<128x128xf32> to vector<1x128x128xf32>
      tpu.vector_store %arg6[%c2, %c0_21, %c0_22], %46 {strides = array<i32>} : memref<4x128x128xf32, #tpu.memory_space<vmem>>, vector<1x128x128xf32>,
      %c4_i32_23 = arith.constant 4 : i32
      %47 = arith.muli %arg0, %c4_i32_23 : i32
      %c3_i32 = arith.constant 3 : i32
      %48 = arith.addi %47, %c3_i32 : i32
      %49 = arith.index_cast %48 : i32 to index
      %50 = memref.load %arg3[%49] : memref<4xf32, #tpu.memory_space<smem>>
      %51 = vector.broadcast %50 : f32 to vector<128x128xf32>
      %52 = arith.mulf %51, %19 : vector<128x128xf32>
      %c3 = arith.constant 3 : index
      %c0_24 = arith.constant 0 : index
      %c0_25 = arith.constant 0 : index
      %53 = vector.load %arg6[%c3, %c0_24, %c0_25] : memref<4x128x128xf32, #tpu.memory_space<vmem>>, vector<1x128x128xf32>
      %54 = vector.shape_cast %53 : vector<1x128x128xf32> to vector<128x128xf32>
      %55 = vector.shape_cast %52 : vector<128x128xf32> to vector<1x128x128xf32>
      tpu.vector_store %arg6[%c3, %c0_24, %c0_25], %55 {strides = array<i32>} : memref<4x128x128xf32, #tpu.memory_space<vmem>>, vector<1x128x128xf32>,
    } else {
    }
    %c0 = arith.constant 0 : index
    %c0_1 = arith.constant 0 : index
    %c0_2 = arith.constant 0 : index
    %c0_3 = arith.constant 0 : index
    %3 = vector.load %arg4[%c0, %c0_1, %c0_2, %c0_3] : memref<1x4x128x128xf32, #tpu.memory_space<vmem>>, vector<1x4x128x128xf32>
    %4 = vector.shape_cast %3 : vector<1x4x128x128xf32> to vector<4x128x128xf32>
    %c0_4 = arith.constant 0 : index
    %c0_5 = arith.constant 0 : index
    %c0_6 = arith.constant 0 : index
    %5 = vector.load %arg6[%c0_4, %c0_5, %c0_6] : memref<4x128x128xf32, #tpu.memory_space<vmem>>, vector<4x128x128xf32>
    %6 = arith.addf %4, %5 : vector<4x128x128xf32>
    %c0_7 = arith.constant 0 : index
    %c0_8 = arith.constant 0 : index
    %c0_9 = arith.constant 0 : index
    %c0_10 = arith.constant 0 : index
    %7 = vector.load %arg5[%c0_7, %c0_8, %c0_9, %c0_10] : memref<1x4x128x128xf32, #tpu.memory_space<vmem>>, vector<1x4x128x128xf32>
    %8 = vector.shape_cast %7 : vector<1x4x128x128xf32> to vector<4x128x128xf32>
    %9 = vector.shape_cast %6 : vector<4x128x128xf32> to vector<1x4x128x128xf32>
    tpu.vector_store %arg5[%c0_7, %c0_8, %c0_9, %c0_10], %9 {strides = array<i32>} : memref<1x4x128x128xf32, #tpu.memory_space<vmem>>, vector<1x4x128x128xf32>,
    return
  }
  func.func @transform_0(%arg0: i32, %arg1: i32, %arg2: i32) -> i32 {
    %c0_i32 = arith.constant 0 : i32
    %c0_i32_0 = arith.constant 0 : i32
    return %c0_i32 : i32
  }
  func.func @transform_1(%arg0: i32, %arg1: i32, %arg2: i32) -> (i32, i32, i32, i32) {
    %c0_i32 = arith.constant 0 : i32
    %c0_i32_0 = arith.constant 0 : i32
    return %arg2, %arg0, %arg1, %c0_i32 : i32, i32, i32, i32
  }
  func.func @transform_2(%arg0: i32, %arg1: i32, %arg2: i32) -> (i32, i32, i32, i32) {
    %c0_i32 = arith.constant 0 : i32
    %c0_i32_0 = arith.constant 0 : i32
    return %arg2, %arg0, %arg1, %c0_i32 : i32, i32, i32, i32
  }
}

</mosaic_0001>

<bundles_post_ra>
// kernel: tpu_custom_call.1
= control target key start
LH: loop header
LB: loop body
LE: loop exit
PB: predicated region body
PF: predicated region fallthrough
CT: control target
= control target key end

     0   :  { %7 = vsyncpa [#allocation6], 0  ;;  %s1568_s0 = inlined_call_operand.vmem [shape: f32[4], index: 0, kind: input, shape index: {}]   ;;  %s1569_s1 = inlined_call_operand.hbm [shape: f32[2,4,128,128], index: 1, kind: input, shape index: {}, may-alias: {1,2}]   ;;  %s1570_s2 = inlined_call_operand.hbm [shape: f32[2,4,128,128], index: 2, kind: output, shape index: {}, may-alias: {1,2}]  }
   0x1   :  { %8 = vsyncpa [#allocation4], 0 }
   0x2   :  { %10 = vsyncpa [#allocation4 + $0x1], 0 }
   0x3   :  { %11 = vsyncpa [#allocation5], 0 }
   0x4   :  { %13 = vsyncpa [#allocation5 + $0x1], 0  ;;  %s1130_s9 = smov 0   ;;  %s1132_s10 = smov 0  }
   0x5   :  { %s1134_s11 = smov 0   ;;  %s1136_s12 = smov 0  }
   0x6   :  { %s1138_s13 = smov 0   ;;  %s1140_s14 = smov 0  }
   0x7 LB: > { %s845_s15 = sadd.s32 4294967295, %s1108_s14   ;;  %s846_s16 = sadd.s32 4294967294, %s1108_s14   ;;  %s1108_s14 = sphi %s1140_s14, %s19_s14   ;;  %s1104_s13 = sphi %s1138_s13, %s1582_s13   ;;  %s1100_s12 = sphi %s1136_s12, %s1581_s12   ;;  %s1096_s11 = sphi %s1134_s11, %s1580_s11   ;;  %s1092_s10 = sphi %s1132_s10, %s1579_s10   ;;  %s1088_s9 = sphi %s1130_s9, %s1578_s9  }
   0x8   : > { %s70_s17 = sadd.s32 1, %s1096_s11  ;;  %p77_p0 = scmp.ne.s32.totalorder %s1096_s11, %s1092_s10 }
   0x9   : > { %p78_p1 = scmp.eq.s32.totalorder %s1108_s14, 0  ;;  %p83_p2 = scmp.ne.s32.totalorder %s1092_s10, %s1088_s9 }
   0xa   : > { %p1168_p3 = scmp.eq.s32.totalorder %s845_s15, 0  ;;  %p111_p4 = scmp.eq.s32.totalorder %s845_s15, 1 }
   0xb   : > { %p1172_p5 = por %p78_p1, %p77_p0  ;;  %p117_p6 = scmp.eq.s32.totalorder %s846_s16, 1 }
   0xc   : > { %p1178_p7 = por %p1168_p3, %p83_p2  ;;  %p1182_p8 = por %p111_p4, %p77_p0 }
   0xd   : > { %p1186_p9 = por %p117_p6, %p83_p2  ;;  %p847_p10 = scmp.ge.s32.totalorder %s1108_s14, 1 }
   0xe   : > { %p124_p11 = scmp.lt.s32.totalorder %s1108_s14, 3  ;;  %s136_s25 = sshll.u32 %s1568_s0, 4  ;;  %s137_s25 = int_to_ptr.vmem [resolvable:$true] %s136_s25 }
   0xf   : > { %p849_p13 = scmp.ge.s32.totalorder %s1108_s14, 2  ;;  %p921_p0 = scmp.lt.s32.totalorder %s1108_s14, 2 }
  0x10   : > { %p1195_p12 = pnand %p847_p10, %p124_p11  ;;  %s31_s28 = sadd.s32 1, %s1104_s13 }
  0x11   : > { %p1205_p2 = pnand %p921_p0, %p1172_p5  ;;  %p32_p6 = scmp.ge.s32.totalorder %s31_s28, 2 }
  0x12   : > { %p908_p1 = pneg %p1195_p12  ;;  %s147_s29 = sand.u32 1, %s1096_s11  }
  0x13   : > { %s1110_s30 = smov [#allocation3]   ;;  %s1584_s28 = smov (%p32_p6, %s31_s28), 0 }
  0x14   : > { %p909_p4 = pnand %p908_p1, %p1168_p3  ;;  %s850_s3 = sshll.u32 %s147_s29, 9 }
  0x15   : > { %s63_s4 = ssub.s32 %s1104_s13, %s1584_s28  ;;  %s898_s5 = sshll.u32 %s1104_s13, 9 }
  0x16   : > { %911 = dma.vmem_to_smem (!%p909_p4), %s137_s25, 16, %s1110_s30, [#allocation6]  }
  0x17   : > { %p68_p10 = scmp.eq.s32.totalorder %s63_s4, 0  ;;  %s161_s8 = scalar_lea.hbm %s1569_s1, %s898_s5 }
  0x18   : > { %s151_s15 = scalar_lea.vmem [#allocation7], %s850_s3  ;;  %s162_s23 = sshll.u32 %s161_s8, 4  ;;  %s163_s23 = int_to_ptr.hbm [resolvable:$true] %s162_s23 }
  0x19   : > { %s164_s16 = sshll.u32 %s151_s15, 4  ;;  %s148_s24 = scalar_lea.sflag [#allocation4], %s147_s29  ;;  %s165_s16 = int_to_ptr.vmem [resolvable:$true] %s164_s16 }
  0x1a   : > { %s1224_s19 = scalar_select %p68_p10, %s1096_s11, %s70_s17  }
  0x1b   : > { %s1111_s25 = smov 128   ;;  %s1112_s30 = smov 8  }
  0x1c   : > { %915 = dma.hbm_to_vmem [thread:$0]  (!%p1205_p2), %s163_s23, 8192, %s165_s16, %s148_s24, %s1111_s25, %s1111_s25, %s1112_s30  }
  0x1d   : > { %176 = sbr.rel (%p1195_p12) target bundleno = 197 (0xc5), region = 28 }
  0x22   : > { %1075 = dma.done.wait (%p1168_p3), [#allocation6], 16  }
  0x23   : > { %1077 = vsyncadd (%p1168_p3), [#allocation6], 4294967280  ;;  %s1235_s17 = sand.u32 1, %s1092_s10  }
  0x24   : > { %s855_s29 = sshll.u32 %s1235_s17, 9  ;;  %s184_s3 = scalar_lea.sflag [#allocation4], %s1235_s17 }
  0x25   : > { %s1239_s4 = scalar_lea.vmem [#allocation7], %s855_s29 }
  0x26   : > { %1079 = dma.done.wait (%p1178_p7), %s184_s3, 8192  }
  0x27   : > { %1081 = vsyncadd (%p1178_p7), %s184_s3, 4294959104 }
  0x28   : > { %193 = sfence }
  0x29   : > { %s1245_s26 = scalar_lea.vmem [#allocation8], %s855_s29  ;;  %p857_p3 = scmp.ne.s32.totalorder %s1100_s12, 0 }
  0x2a   : > { %s320_s18 = sld [smem:[#allocation3]] (!%p857_p3) }
  0x2b   : > { %217 = sbr.rel (%p857_p3) target bundleno = 127 (0x7f), region = 40  ;;  %s1308_s20 = sld [smem:[#allocation3 + $0x1]] (!%p857_p3) }
  0x2c   : > { %s891_s27 = sld [smem:[#allocation3 + $0x2]] (!%p857_p3) }
  0x2d   : > { %s892_s5 = sld [smem:[#allocation3 + $0x3]] (!%p857_p3) }
  0x30   : > { %v219_v0 = vlaneseq  ;;  %v1261_v12 = vstv %s320_s18 }
  0x32   : > { %v1248_v1 = vshrl.u32 %v219_v0, 7  ;;  %v1250_v2 = vand.u32 127, %v219_v0 }
  0x34   : > { %v238_v3 = vsub.s32 %v1248_v1, %v1250_v2  ;;  %v221_v4 = vadd.s32 8, %v1248_v1  ;;  %v222_v5 = vadd.s32 16, %v1248_v1  ;;  %v223_v6 = vadd.s32 24, %v1248_v1 }
  0x35   : > { %v224_v7 = vadd.s32 32, %v1248_v1  ;;  %v225_v8 = vadd.s32 40, %v1248_v1  ;;  %v226_v9 = vadd.s32 48, %v1248_v1  ;;  %v227_v10 = vadd.s32 56, %v1248_v1 }
  0x36   : > { %vm271_vm0 = vcmp.gt.s32.totalorder %v238_v3, 0  ;;  %v858_v11 = vcvt.s32.f32 %v238_v3  ;;  %v239_v13 = vsub.s32 %v221_v4, %v1250_v2  ;;  %v240_v14 = vsub.s32 %v222_v5, %v1250_v2 }
  0x37   : > { %v241_v15 = vsub.s32 %v223_v6, %v1250_v2  ;;  %v242_v16 = vsub.s32 %v224_v7, %v1250_v2  ;;  %v243_v17 = vsub.s32 %v225_v8, %v1250_v2  ;;  %v244_v20 = vsub.s32 %v226_v9, %v1250_v2 }
  0x38   : > { %v1268_v18 = vsel %vm271_vm0, %v858_v11, 0.0  ;;  %vm273_vm1 = vcmp.gt.s32.totalorder %v239_v13, 0  ;;  %v860_v19 = vcvt.s32.f32 %v239_v13  ;;  %vm275_vm2 = vcmp.gt.s32.totalorder %v240_v14, 0 }
  0x39   : > { %v322_v21 = vmul.f32 %v1268_v18, %v1261_v12  ;;  %v862_v22 = vcvt.s32.f32 %v240_v14  ;;  %vm277_vm3 = vcmp.gt.s32.totalorder %v241_v15, 0  ;;  %v864_v24 = vcvt.s32.f32 %v241_v15 }
  0x3a   : > { %v1273_v23 = vsel %vm273_vm1, %v860_v19, 0.0  ;;  %vm279_vm4 = vcmp.gt.s32.totalorder %v242_v16, 0  ;;  %v866_v25 = vcvt.s32.f32 %v242_v16  ;;  %vm281_vm5 = vcmp.gt.s32.totalorder %v243_v17, 0 }
  0x3b   : > { %338 = vst [vmem:[#allocation2 + $0xb0] sm:$0xff] %v322_v21  ;;  %v323_v26 = vmul.f32 %v1273_v23, %v1261_v12  ;;  %v1277_v27 = vsel %vm275_vm2, %v862_v22, 0.0  ;;  %v868_v28 = vcvt.s32.f32 %v243_v17  ;;  %v1281_v30 = vsel %vm277_vm3, %v864_v24, 0.0 }
  0x3c   : > { %v324_v29 = vmul.f32 %v1277_v27, %v1261_v12  ;;  %v1283_v31 = vsel %vm279_vm4, %v866_v25, 0.0  ;;  %vm283_vm6 = vcmp.gt.s32.totalorder %v244_v20, 0  ;;  %v325_v32 = vmul.f32 %v1281_v30, %v1261_v12 }
  0x3d   : > { %339 = vst [vmem:[#allocation2 + $0x1b0] sm:$0xff] %v323_v26  ;;  %v326_v33 = vmul.f32 %v1283_v31, %v1261_v12  ;;  %v1289_v34 = vsel %vm281_vm5, %v868_v28, 0.0  ;;  %v870_v35 = vcvt.s32.f32 %v244_v20  ;;  %v245_v37 = vsub.s32 %v227_v10, %v1250_v2 }
  0x3e   : > { %340 = vst [vmem:[#allocation2 + $0xd8] sm:$0xff] %v324_v29  ;;  %v327_v36 = vmul.f32 %v1289_v34, %v1261_v12  ;;  %v228_v38 = vadd.s32 64, %v1248_v1  ;;  %v229_v39 = vadd.s32 72, %v1248_v1  ;;  %v230_v41 = vadd.s32 80, %v1248_v1 }
  0x3f   : > { %341 = vst [vmem:[#allocation2 + $0x18] sm:$0xff] %v325_v32  ;;  %v1296_v40 = vsel %vm283_vm6, %v870_v35, 0.0  ;;  %v231_v42 = vadd.s32 88, %v1248_v1  ;;  %v232_v43 = vadd.s32 96, %v1248_v1  ;;  %vm285_vm7 = vcmp.gt.s32.totalorder %v245_v37, 0 }
  0x40   : > { %342 = vst [vmem:[#allocation2 + $0x50] sm:$0xff] %v326_v33  ;;  %v328_v44 = vmul.f32 %v1296_v40, %v1261_v12  ;;  %v872_v45 = vcvt.s32.f32 %v245_v37  ;;  %v246_v46 = vsub.s32 %v228_v38, %v1250_v2  ;;  %v247_v47 = vsub.s32 %v229_v39, %v1250_v2 }
  0x41   : > { %343 = vst [vmem:[#allocation2 + $0x168] sm:$0xff] %v327_v36  ;;  %v248_v48 = vsub.s32 %v230_v41, %v1250_v2  ;;  %v249_v49 = vsub.s32 %v231_v42, %v1250_v2  ;;  %v250_v50 = vsub.s32 %v232_v43, %v1250_v2  ;;  %v233_v53 = vadd.s32 104, %v1248_v1 }
  0x42   : > { %344 = vst [vmem:[#allocation2 + $0x130] sm:$0xff] %v328_v44  ;;  %v1310_v51 = vsel %vm285_vm7, %v872_v45, 0.0  ;;  %vm287_vm8 = vcmp.gt.s32.totalorder %v246_v46, 0  ;;  %v874_v52 = vcvt.s32.f32 %v246_v46  ;;  %vm289_vm9 = vcmp.gt.s32.totalorder %v247_v47, 0 }
  0x43   : > { %v329_v54 = vmul.f32 %v1310_v51, %v1261_v12  ;;  %v876_v55 = vcvt.s32.f32 %v247_v47  ;;  %vm291_vm10 = vcmp.gt.s32.totalorder %v248_v48, 0  ;;  %v878_v57 = vcvt.s32.f32 %v248_v48 }
  0x44   : > { %v1315_v56 = vsel %vm287_vm8, %v874_v52, 0.0  ;;  %vm293_vm11 = vcmp.gt.s32.totalorder %v249_v49, 0  ;;  %v880_v58 = vcvt.s32.f32 %v249_v49  ;;  %vm295_vm12 = vcmp.gt.s32.totalorder %v250_v50, 0 }
  0x45   : > { %345 = vst [vmem:[#allocation2 + $0x48] sm:$0xff] %v329_v54  ;;  %v330_v59 = vmul.f32 %v1315_v56, %v1261_v12  ;;  %v1319_v60 = vsel %vm289_vm9, %v876_v55, 0.0  ;;  %v882_v61 = vcvt.s32.f32 %v250_v50  ;;  %v1323_v63 = vsel %vm291_vm10, %v878_v57, 0.0 }
  0x46   : > { %v331_v62 = vmul.f32 %v1319_v60, %v1261_v12  ;;  %v1325_v0 = vsel %vm293_vm11, %v880_v58, 0.0  ;;  %v251_v3 = vsub.s32 %v233_v53, %v1250_v2  ;;  %v332_v4 = vmul.f32 %v1323_v63, %v1261_v12 }
  0x47   : > { %346 = vst [vmem:[#allocation2 + $0x180] sm:$0xff] %v330_v59  ;;  %v333_v5 = vmul.f32 %v1325_v0, %v1261_v12  ;;  %v1332_v6 = vsel %vm295_vm12, %v882_v61, 0.0  ;;  %v234_v7 = vadd.s32 112, %v1248_v1  ;;  %v235_v10 = vadd.s32 120, %v1248_v1 }
  0x48   : > { %347 = vst [vmem:[#allocation2 + $0x110] sm:$0xff] %v331_v62  ;;  %v334_v8 = vmul.f32 %v1332_v6, %v1261_v12  ;;  %vm297_vm13 = vcmp.gt.s32.totalorder %v251_v3, 0  ;;  %v884_v9 = vcvt.s32.f32 %v251_v3  ;;  %v356_v13 = vstv %s1308_s20 }
  0x49   : > { %348 = vst [vmem:[#allocation2 + $0x118] sm:$0xff] %v332_v4  ;;  %v252_v11 = vsub.s32 %v234_v7, %v1250_v2  ;;  %v253_v15 = vsub.s32 %v235_v10, %v1250_v2  ;;  %v357_v16 = vmul.f32 %v1268_v18, %v356_v13  ;;  %v358_v17 = vmul.f32 %v1273_v23, %v356_v13 }
  0x4a   : > { %349 = vst [vmem:[#allocation2 + $0x98] sm:$0xff] %v333_v5  ;;  %v1340_v14 = vsel %vm297_vm13, %v884_v9, 0.0  ;;  %v359_v1 = vmul.f32 %v1277_v27, %v356_v13  ;;  %v360_v25 = vmul.f32 %v1281_v30, %v356_v13  ;;  %v361_v28 = vmul.f32 %v1283_v31, %v356_v13 }
  0x4b   : > { %350 = vst [vmem:[#allocation2 + $0x120] sm:$0xff] %v334_v8  ;;  %v335_v19 = vmul.f32 %v1340_v14, %v1261_v12  ;;  %vm299_vm14 = vcmp.gt.s32.totalorder %v252_v11, 0  ;;  %v886_v20 = vcvt.s32.f32 %v252_v11  ;;  %vm301_vm15 = vcmp.gt.s32.totalorder %v253_v15, 0 }
  0x4c   : > { %v888_v21 = vcvt.s32.f32 %v253_v15  ;;  %374 = vst [vmem:[#allocation2 + $0xe0] sm:$0xff] %v357_v16  ;;  %v362_v29 = vmul.f32 %v1289_v34, %v356_v13  ;;  %v363_v32 = vmul.f32 %v1296_v40, %v356_v13  ;;  %v364_v33 = vmul.f32 %v1310_v51, %v356_v13 }
  0x4d   : > { %351 = vst [vmem:[#allocation2 + $0x150] sm:$0xff] %v335_v19  ;;  %v1348_v22 = vsel %vm299_vm14, %v886_v20, 0.0  ;;  %v365_v35 = vmul.f32 %v1315_v56, %v356_v13  ;;  %v366_v36 = vmul.f32 %v1319_v60, %v356_v13  ;;  %v368_v37 = vmul.f32 %v1325_v0, %v356_v13 }
  0x4e   : > { %v336_v2 = vmul.f32 %v1348_v22, %v1261_v12  ;;  %v1352_v24 = vsel %vm301_vm15, %v888_v21, 0.0  ;;  %375 = vst [vmem:[#allocation2 + $0x188] sm:$0xff] %v358_v17  ;;  %v369_v38 = vmul.f32 %v1332_v6, %v356_v13  ;;  %v370_v39 = vmul.f32 %v1340_v14, %v356_v13 }
  0x4f   : > { %v337_v26 = vmul.f32 %v1352_v24, %v1261_v12  ;;  %376 = vst [vmem:[#allocation2 + $0x138] sm:$0xff] %v359_v1  ;;  %v367_v12 = vmul.f32 %v1323_v63, %v356_v13  ;;  %v392_v41 = vstv %s891_s27  ;;  %v371_v42 = vmul.f32 %v1348_v22, %v356_v13 }
  0x50   : > { %352 = vst [vmem:[#allocation2 + $0x108] sm:$0xff] %v336_v2  ;;  %v372_v43 = vmul.f32 %v1352_v24, %v356_v13  ;;  %v393_v44 = vmul.f32 %v1268_v18, %v392_v41  ;;  %v394_v45 = vmul.f32 %v1273_v23, %v392_v41  ;;  %v395_v46 = vmul.f32 %v1277_v27, %v392_v41 }
  0x51   : > { %353 = vst [vmem:[#allocation2 + $0x60] sm:$0xff] %v337_v26  ;;  %v396_v47 = vmul.f32 %v1281_v30, %v392_v41  ;;  %v397_v48 = vmul.f32 %v1283_v31, %v392_v41  ;;  %v398_v49 = vmul.f32 %v1289_v34, %v392_v41  ;;  %v399_v50 = vmul.f32 %v1296_v40, %v392_v41 }
  0x52   : > { %377 = vst [vmem:[#allocation2 + $0x140] sm:$0xff] %v360_v25  ;;  %v400_v52 = vmul.f32 %v1310_v51, %v392_v41  ;;  %v401_v53 = vmul.f32 %v1315_v56, %v392_v41  ;;  %v402_v54 = vmul.f32 %v1319_v60, %v392_v41  ;;  %v403_v55 = vmul.f32 %v1323_v63, %v392_v41 }
  0x53   : > { %378 = vst [vmem:[#allocation2 + $0x80] sm:$0xff] %v361_v28  ;;  %v404_v57 = vmul.f32 %v1325_v0, %v392_v41  ;;  %v405_v58 = vmul.f32 %v1332_v6, %v392_v41  ;;  %v406_v59 = vmul.f32 %v1340_v14, %v392_v41  ;;  %v428_v61 = vstv %s892_s5 }
  0x54   : > { %379 = vst [vmem:[#allocation2 + $0x1a8] sm:$0xff] %v362_v29  ;;  %v407_v62 = vmul.f32 %v1348_v22, %v392_v41  ;;  %v408_v3 = vmul.f32 %v1352_v24, %v392_v41  ;;  %v429_v4 = vmul.f32 %v1268_v18, %v428_v61  ;;  %v430_v5 = vmul.f32 %v1273_v23, %v428_v61 }
  0x55   : > { %380 = vst [vmem:[#allocation2 + $0x1b8] sm:$0xff] %v363_v32  ;;  %v431_v7 = vmul.f32 %v1277_v27, %v428_v61  ;;  %v432_v8 = vmul.f32 %v1281_v30, %v428_v61  ;;  %v433_v9 = vmul.f32 %v1283_v31, %v428_v61  ;;  %v434_v10 = vmul.f32 %v1289_v34, %v428_v61 }
  0x56   : > { %381 = vst [vmem:[#allocation2 + $0x28] sm:$0xff] %v364_v33  ;;  %v435_v11 = vmul.f32 %v1296_v40, %v428_v61  ;;  %v436_v18 = vmul.f32 %v1310_v51, %v428_v61  ;;  %v437_v23 = vmul.f32 %v1315_v56, %v428_v61  ;;  %v438_v27 = vmul.f32 %v1319_v60, %v428_v61 }
  0x57   : > { %382 = vst [vmem:[#allocation2 + $0x1e8] sm:$0xff] %v365_v35  ;;  %v439_v30 = vmul.f32 %v1323_v63, %v428_v61  ;;  %v440_v31 = vmul.f32 %v1325_v0, %v428_v61  ;;  %v441_v34 = vmul.f32 %v1332_v6, %v428_v61  ;;  %v442_v40 = vmul.f32 %v1340_v14, %v428_v61 }
  0x58   : > { %383 = vst [vmem:[#allocation2 + $0xf8] sm:$0xff] %v366_v36  ;;  %v443_v51 = vmul.f32 %v1348_v22, %v428_v61  ;;  %v444_v56 = vmul.f32 %v1352_v24, %v428_v61 }
  0x59   : > { %384 = vst [vmem:[#allocation2 + $0x160] sm:$0xff] %v367_v12 }
  0x5a   : > { %385 = vst [vmem:[#allocation2 + $0x30] sm:$0xff] %v368_v37 }
  0x5b   : > { %386 = vst [vmem:[#allocation2 + $0x1e0] sm:$0xff] %v369_v38 }
  0x5c   : > { %387 = vst [vmem:[#allocation2] sm:$0xff] %v370_v39 }
  0x5d   : > { %388 = vst [vmem:[#allocation2 + $0xf0] sm:$0xff] %v371_v42 }
  0x5e   : > { %389 = vst [vmem:[#allocation2 + $0x8] sm:$0xff] %v372_v43 }
  0x5f   : > { %410 = vst [vmem:[#allocation2 + $0x148] sm:$0xff] %v393_v44 }
  0x60   : > { %411 = vst [vmem:[#allocation2 + $0x1d0] sm:$0xff] %v394_v45 }
  0x61   : > { %412 = vst [vmem:[#allocation2 + $0x100] sm:$0xff] %v395_v46 }
  0x62   : > { %413 = vst [vmem:[#allocation2 + $0xc8] sm:$0xff] %v396_v47 }
  0x63   : > { %414 = vst [vmem:[#allocation2 + $0x40] sm:$0xff] %v397_v48 }
  0x64   : > { %415 = vst [vmem:[#allocation2 + $0x1f8] sm:$0xff] %v398_v49 }
  0x65   : > { %416 = vst [vmem:[#allocation2 + $0x20] sm:$0xff] %v399_v50 }
  0x66   : > { %417 = vst [vmem:[#allocation2 + $0x128] sm:$0xff] %v400_v52 }
  0x67   : > { %418 = vst [vmem:[#allocation2 + $0x1a0] sm:$0xff] %v401_v53 }
  0x68   : > { %419 = vst [vmem:[#allocation2 + $0x1f0] sm:$0xff] %v402_v54 }
  0x69   : > { %420 = vst [vmem:[#allocation2 + $0xe8] sm:$0xff] %v403_v55 }
  0x6a   : > { %421 = vst [vmem:[#allocation2 + $0x78] sm:$0xff] %v404_v57 }
  0x6b   : > { %422 = vst [vmem:[#allocation2 + $0x70] sm:$0xff] %v405_v58 }
  0x6c   : > { %423 = vst [vmem:[#allocation2 + $0x90] sm:$0xff] %v406_v59 }
  0x6d   : > { %424 = vst [vmem:[#allocation2 + $0x1d8] sm:$0xff] %v407_v62 }
  0x6e   : > { %425 = vst [vmem:[#allocation2 + $0xd0] sm:$0xff] %v408_v3 }
  0x6f   : > { %446 = vst [vmem:[#allocation2 + $0xb8] sm:$0xff] %v429_v4 }
  0x70   : > { %447 = vst [vmem:[#allocation2 + $0x88] sm:$0xff] %v430_v5 }
  0x71   : > { %448 = vst [vmem:[#allocation2 + $0xa8] sm:$0xff] %v431_v7 }
  0x72   : > { %449 = vst [vmem:[#allocation2 + $0x1c8] sm:$0xff] %v432_v8 }
  0x73   : > { %450 = vst [vmem:[#allocation2 + $0x170] sm:$0xff] %v433_v9 }
  0x74   : > { %451 = vst [vmem:[#allocation2 + $0x178] sm:$0xff] %v434_v10 }
  0x75   : > { %452 = vst [vmem:[#allocation2 + $0x68] sm:$0xff] %v435_v11 }
  0x76   : > { %453 = vst [vmem:[#allocation2 + $0x190] sm:$0xff] %v436_v18 }
  0x77   : > { %454 = vst [vmem:[#allocation2 + $0x198] sm:$0xff] %v437_v23 }
  0x78   : > { %455 = vst [vmem:[#allocation2 + $0x38] sm:$0xff] %v438_v27 }
  0x79   : > { %456 = vst [vmem:[#allocation2 + $0xc0] sm:$0xff] %v439_v30 }
  0x7a   : > { %457 = vst [vmem:[#allocation2 + $0x1c0] sm:$0xff] %v440_v31 }
  0x7b   : > { %458 = vst [vmem:[#allocation2 + $0x158] sm:$0xff] %v441_v34 }
  0x7c   : > { %459 = vst [vmem:[#allocation2 + $0x10] sm:$0xff] %v442_v40 }
  0x7d   : > { %460 = vst [vmem:[#allocation2 + $0x58] sm:$0xff] %v443_v51 }
  0x7e   : > { %461 = vst [vmem:[#allocation2 + $0xa0] sm:$0xff] %v444_v56 }
  0x7f PF: > { %v462_v60 = vld [vmem:[%s1239_s4] sm:$0xff]  ;;  %v526_v63 = vld [vmem:[#allocation2 + $0xb0] sm:$0xff]  ;;  %v463_v0 = vld [vmem:[%s1239_s4 + $0x8] sm:$0xff]  ;;  %s899_s6 = sshll.u32 %s1100_s12, 9  ;;  %s736_s15 = sshll.u32 %s1245_s26, 4  ;;  %s737_s15 = int_to_ptr.vmem [resolvable:$true] %s736_s15 }
  0x80   : > { %v590_v6 = vadd.f32 %v526_v63, %v462_v60  ;;  %v527_v13 = vld [vmem:[#allocation2 + $0x1b0] sm:$0xff]  ;;  %v528_v15 = vld [vmem:[#allocation2 + $0xd8] sm:$0xff]  ;;  %v466_v1 = vld [vmem:[%s1239_s4 + $0x20] sm:$0xff]  ;;  %s735_s8 = scalar_lea.hbm %s1570_s2, %s899_s6  ;;  %s719_s23 = scalar_lea.sflag [#allocation5], %s1235_s17 }
  0x81   : > { %v464_v14 = vld [vmem:[%s1239_s4 + $0x10] sm:$0xff]  ;;  %v591_v16 = vadd.f32 %v527_v13, %v463_v0  ;;  %v465_v19 = vld [vmem:[%s1239_s4 + $0x18] sm:$0xff]  ;;  %v467_v2 = vld [vmem:[%s1239_s4 + $0x28] sm:$0xff]  ;;  %s738_s16 = sshll.u32 %s735_s8, 4  ;;  %s1042_s3 = scalar_lea.hbm %s1570_s2, 1024  ;;  %s739_s16 = int_to_ptr.hbm [resolvable:$true] %s738_s16 }
  0x82   : > { %v592_v17 = vadd.f32 %v528_v15, %v464_v14  ;;  %v529_v20 = vld [vmem:[#allocation2 + $0x18] sm:$0xff]  ;;  %654 = vst [vmem:[%s1245_s26] sm:$0xff] %v590_v6  ;;  %v530_v22 = vld [vmem:[#allocation2 + $0x50] sm:$0xff]  ;;  %v531_v24 = vld [vmem:[#allocation2 + $0x168] sm:$0xff]  ;;  %s1036_s24 = sshra.s32 %s739_s16, 4  ;;  %s1037_s24 = int_to_ptr.hbm [resolvable:$true] %s1036_s24 }
  0x83   : > { %v593_v21 = vadd.f32 %v529_v20, %v465_v19  ;;  %655 = vst [vmem:[%s1245_s26 + $0x8] sm:$0xff] %v591_v16  ;;  %v594_v25 = vadd.f32 %v530_v22, %v466_v1  ;;  %v595_v26 = vadd.f32 %v531_v24, %v467_v2  ;;  %v468_v28 = vld [vmem:[%s1239_s4 + $0x30] sm:$0xff]  ;;  %v469_v32 = vld [vmem:[%s1239_s4 + $0x38] sm:$0xff]  ;;  %v533_v35 = vld [vmem:[#allocation2 + $0x48] sm:$0xff]  ;;  %s1038_s25 = scalar_lea.hbm %s1037_s24, 512  ;;  %p1043_p12 = scmp.lt.s32.totalorder %s1037_s24, %s1570_s2 }
  0x84   : > { %v532_v29 = vld [vmem:[#allocation2 + $0x130] sm:$0xff]  ;;  %656 = vst [vmem:[%s1245_s26 + $0x10] sm:$0xff] %v592_v17  ;;  %v470_v36 = vld [vmem:[%s1239_s4 + $0x40] sm:$0xff]  ;;  %v597_v37 = vadd.f32 %v533_v35, %v469_v32  ;;  %v471_v38 = vld [vmem:[%s1239_s4 + $0x48] sm:$0xff]  ;;  %p1039_p5 = scmp.ne.s32.totalorder %s1037_s24, %s1038_s25  ;;  %p1044_p0 = scmp.lt.s32.totalorder %s1042_s3, %s1038_s25 }
  0x85   : > { %v596_v33 = vadd.f32 %v532_v29, %v468_v28  ;;  %v534_v12 = vld [vmem:[#allocation2 + $0x180] sm:$0xff]  ;;  %657 = vst [vmem:[%s1245_s26 + $0x18] sm:$0xff] %v593_v21  ;;  %v535_v39 = vld [vmem:[#allocation2 + $0x110] sm:$0xff]  ;;  %v536_v43 = vld [vmem:[#allocation2 + $0x118] sm:$0xff] }
  0x86   : > { %v472_v41 = vld [vmem:[%s1239_s4 + $0x50] sm:$0xff]  ;;  %658 = vst [vmem:[%s1245_s26 + $0x20] sm:$0xff] %v594_v25  ;;  %v598_v42 = vadd.f32 %v534_v12, %v470_v36  ;;  %v473_v44 = vld [vmem:[%s1239_s4 + $0x58] sm:$0xff]  ;;  %v599_v46 = vadd.f32 %v535_v39, %v471_v38  ;;  %v474_v47 = vld [vmem:[%s1239_s4 + $0x60] sm:$0xff]  ;;  %p1040_p7 = pnand %p1039_p5, %p1182_p8  ;;  %p1045_p1 = por %p1044_p0, %p1043_p12 }
  0x87   : > { %v537_v45 = vld [vmem:[#allocation2 + $0x98] sm:$0xff]  ;;  %659 = vst [vmem:[%s1245_s26 + $0x28] sm:$0xff] %v595_v26  ;;  %v538_v48 = vld [vmem:[#allocation2 + $0x120] sm:$0xff]  ;;  %v600_v49 = vadd.f32 %v536_v43, %v472_v41  ;;  %v475_v50 = vld [vmem:[%s1239_s4 + $0x68] sm:$0xff] }
  0x88   : > { %660 = vst [vmem:[%s1245_s26 + $0x30] sm:$0xff] %v596_v33  ;;  %v539_v52 = vld [vmem:[#allocation2 + $0x150] sm:$0xff]  ;;  %v601_v53 = vadd.f32 %v537_v45, %v473_v44  ;;  %v540_v55 = vld [vmem:[#allocation2 + $0x108] sm:$0xff]  ;;  %v602_v57 = vadd.f32 %v538_v48, %v474_v47  ;;  %v477_v58 = vld [vmem:[%s1239_s4 + $0x78] sm:$0xff]  ;;  %p1041_p11 = pneg %p1040_p7 }
  0x89   : > { %661 = vst [vmem:[%s1245_s26 + $0x38] sm:$0xff] %v597_v37  ;;  %v476_v54 = vld [vmem:[%s1239_s4 + $0x70] sm:$0xff]  ;;  %v541_v59 = vld [vmem:[#allocation2 + $0x60] sm:$0xff]  ;;  %v603_v61 = vadd.f32 %v539_v52, %v475_v50  ;;  %v479_v5 = vld [vmem:[%s1239_s4 + $0x88] sm:$0xff] }
  0x8a   : > { %662 = vst [vmem:[%s1245_s26 + $0x40] sm:$0xff] %v598_v42  ;;  %v478_v62 = vld [vmem:[%s1239_s4 + $0x80] sm:$0xff]  ;;  %v604_v4 = vadd.f32 %v540_v55, %v476_v54  ;;  %v543_v7 = vld [vmem:[#allocation2 + $0x188] sm:$0xff]  ;;  %v605_v8 = vadd.f32 %v541_v59, %v477_v58  ;;  %v480_v9 = vld [vmem:[%s1239_s4 + $0x90] sm:$0xff]  ;;  %p1046_p2 = pnand %p1045_p1, %p1041_p11 }
  0x8b   : > { %663 = vst [vmem:[%s1245_s26 + $0x48] sm:$0xff] %v599_v46  ;;  %v542_v3 = vld [vmem:[#allocation2 + $0xe0] sm:$0xff]  ;;  %v544_v10 = vld [vmem:[#allocation2 + $0x138] sm:$0xff]  ;;  %v607_v27 = vadd.f32 %v543_v7, %v479_v5  ;;  %v483_v40 = vld [vmem:[%s1239_s4 + $0xa8] sm:$0xff] }
  0x8c   : > { %664 = vst [vmem:[%s1245_s26 + $0x50] sm:$0xff] %v600_v49  ;;  %v606_v11 = vadd.f32 %v542_v3, %v478_v62  ;;  %v481_v18 = vld [vmem:[%s1239_s4 + $0x98] sm:$0xff]  ;;  %v545_v23 = vld [vmem:[#allocation2 + $0x140] sm:$0xff]  ;;  %v608_v34 = vadd.f32 %v544_v10, %v480_v9  ;;  %v547_v51 = vld [vmem:[#allocation2 + $0x1a8] sm:$0xff] }
  0x8d   : > { %665 = vst [vmem:[%s1245_s26 + $0x58] sm:$0xff] %v601_v53  ;;  %v482_v30 = vld [vmem:[%s1239_s4 + $0xa0] sm:$0xff]  ;;  %v609_v56 = vadd.f32 %v545_v23, %v481_v18  ;;  %v484_v60 = vld [vmem:[%s1239_s4 + $0xb0] sm:$0xff]  ;;  %v548_v63 = vld [vmem:[#allocation2 + $0x1b8] sm:$0xff]  ;;  %v611_v14 = vadd.f32 %v547_v51, %v483_v40 }
  0x8e   : > { %666 = vst [vmem:[%s1245_s26 + $0x60] sm:$0xff] %v602_v57  ;;  %v546_v31 = vld [vmem:[#allocation2 + $0x80] sm:$0xff]  ;;  %v485_v6 = vld [vmem:[%s1239_s4 + $0xb8] sm:$0xff]  ;;  %v549_v13 = vld [vmem:[#allocation2 + $0x28] sm:$0xff]  ;;  %v612_v17 = vadd.f32 %v548_v63, %v484_v60 }
  0x8f   : > { %667 = vst [vmem:[%s1245_s26 + $0x68] sm:$0xff] %v603_v61  ;;  %v610_v0 = vadd.f32 %v546_v31, %v482_v30  ;;  %v486_v15 = vld [vmem:[%s1239_s4 + $0xc0] sm:$0xff]  ;;  %v550_v16 = vld [vmem:[#allocation2 + $0x1e8] sm:$0xff]  ;;  %v551_v20 = vld [vmem:[#allocation2 + $0xf8] sm:$0xff]  ;;  %v613_v1 = vadd.f32 %v549_v13, %v485_v6 }
  0x90   : > { %668 = vst [vmem:[%s1245_s26 + $0x70] sm:$0xff] %v604_v4  ;;  %v487_v19 = vld [vmem:[%s1239_s4 + $0xc8] sm:$0xff]  ;;  %v488_v21 = vld [vmem:[%s1239_s4 + $0xd0] sm:$0xff]  ;;  %v552_v22 = vld [vmem:[#allocation2 + $0x160] sm:$0xff]  ;;  %v614_v2 = vadd.f32 %v550_v16, %v486_v15 }
  0x91   : > { %669 = vst [vmem:[%s1245_s26 + $0x78] sm:$0xff] %v605_v8  ;;  %v489_v24 = vld [vmem:[%s1239_s4 + $0xd8] sm:$0xff]  ;;  %v553_v25 = vld [vmem:[#allocation2 + $0x30] sm:$0xff]  ;;  %v615_v26 = vadd.f32 %v551_v20, %v487_v19  ;;  %v490_v28 = vld [vmem:[%s1239_s4 + $0xe0] sm:$0xff]  ;;  %v616_v32 = vadd.f32 %v552_v22, %v488_v21 }
  0x92   : > { %670 = vst [vmem:[%s1245_s26 + $0x80] sm:$0xff] %v606_v11  ;;  %v554_v29 = vld [vmem:[#allocation2 + $0x1e0] sm:$0xff]  ;;  %v491_v33 = vld [vmem:[%s1239_s4 + $0xe8] sm:$0xff]  ;;  %v617_v36 = vadd.f32 %v553_v25, %v489_v24  ;;  %v492_v12 = vld [vmem:[%s1239_s4 + $0xf0] sm:$0xff] }
  0x93   : > { %671 = vst [vmem:[%s1245_s26 + $0x88] sm:$0xff] %v607_v27  ;;  %v555_v35 = vld [vmem:[#allocation2] sm:$0xff]  ;;  %v556_v37 = vld [vmem:[#allocation2 + $0xf0] sm:$0xff]  ;;  %v618_v38 = vadd.f32 %v554_v29, %v490_v28  ;;  %v493_v39 = vld [vmem:[%s1239_s4 + $0xf8] sm:$0xff] }
  0x94   : > { %672 = vst [vmem:[%s1245_s26 + $0x90] sm:$0xff] %v608_v34  ;;  %v557_v41 = vld [vmem:[#allocation2 + $0x8] sm:$0xff]  ;;  %v619_v42 = vadd.f32 %v555_v35, %v491_v33  ;;  %v494_v43 = vld [vmem:[%s1239_s4 + $0x100] sm:$0xff]  ;;  %v620_v45 = vadd.f32 %v556_v37, %v492_v12  ;;  %v559_v47 = vld [vmem:[#allocation2 + $0x1d0] sm:$0xff] }
  0x95   : > { %673 = vst [vmem:[%s1245_s26 + $0x98] sm:$0xff] %v609_v56  ;;  %v558_v44 = vld [vmem:[#allocation2 + $0x148] sm:$0xff]  ;;  %v621_v48 = vadd.f32 %v557_v41, %v493_v39  ;;  %v496_v49 = vld [vmem:[%s1239_s4 + $0x110] sm:$0xff]  ;;  %v560_v50 = vld [vmem:[#allocation2 + $0x100] sm:$0xff] }
  0x96   : > { %674 = vst [vmem:[%s1245_s26 + $0xa0] sm:$0xff] %v610_v0  ;;  %v495_v46 = vld [vmem:[%s1239_s4 + $0x108] sm:$0xff]  ;;  %v622_v52 = vadd.f32 %v558_v44, %v494_v43  ;;  %v497_v53 = vld [vmem:[%s1239_s4 + $0x118] sm:$0xff]  ;;  %v498_v57 = vld [vmem:[%s1239_s4 + $0x120] sm:$0xff]  ;;  %v624_v59 = vadd.f32 %v560_v50, %v496_v49 }
  0x97   : > { %675 = vst [vmem:[%s1245_s26 + $0xa8] sm:$0xff] %v611_v14  ;;  %v561_v54 = vld [vmem:[#allocation2 + $0xc8] sm:$0xff]  ;;  %v623_v55 = vadd.f32 %v559_v47, %v495_v46  ;;  %v562_v58 = vld [vmem:[#allocation2 + $0x40] sm:$0xff]  ;;  %v563_v62 = vld [vmem:[#allocation2 + $0x1f8] sm:$0xff] }
  0x98   : > { %676 = vst [vmem:[%s1245_s26 + $0xb0] sm:$0xff] %v612_v17  ;;  %v499_v61 = vld [vmem:[%s1239_s4 + $0x128] sm:$0xff]  ;;  %v625_v3 = vadd.f32 %v561_v54, %v497_v53  ;;  %v500_v4 = vld [vmem:[%s1239_s4 + $0x130] sm:$0xff]  ;;  %v564_v5 = vld [vmem:[#allocation2 + $0x20] sm:$0xff]  ;;  %v626_v7 = vadd.f32 %v562_v58, %v498_v57 }
  0x99   : > { %677 = vst [vmem:[%s1245_s26 + $0xb8] sm:$0xff] %v613_v1  ;;  %v501_v8 = vld [vmem:[%s1239_s4 + $0x138] sm:$0xff]  ;;  %v565_v9 = vld [vmem:[#allocation2 + $0x128] sm:$0xff]  ;;  %v627_v10 = vadd.f32 %v563_v62, %v499_v61  ;;  %v502_v11 = vld [vmem:[%s1239_s4 + $0x140] sm:$0xff]  ;;  %v628_v23 = vadd.f32 %v564_v5, %v500_v4 }
  0x9a   : > { %678 = vst [vmem:[%s1245_s26 + $0xc0] sm:$0xff] %v614_v2  ;;  %v566_v18 = vld [vmem:[#allocation2 + $0x1a0] sm:$0xff]  ;;  %v503_v27 = vld [vmem:[%s1239_s4 + $0x148] sm:$0xff]  ;;  %v567_v30 = vld [vmem:[#allocation2 + $0x1f0] sm:$0xff]  ;;  %v629_v31 = vadd.f32 %v565_v9, %v501_v8 }
  0x9b   : > { %679 = vst [vmem:[%s1245_s26 + $0xc8] sm:$0xff] %v615_v26  ;;  %v504_v34 = vld [vmem:[%s1239_s4 + $0x150] sm:$0xff]  ;;  %v568_v40 = vld [vmem:[#allocation2 + $0xe8] sm:$0xff]  ;;  %v630_v51 = vadd.f32 %v566_v18, %v502_v11  ;;  %v505_v56 = vld [vmem:[%s1239_s4 + $0x158] sm:$0xff]  ;;  %v631_v63 = vadd.f32 %v567_v30, %v503_v27 }
  0x9c   : > { %680 = vst [vmem:[%s1245_s26 + $0xd0] sm:$0xff] %v616_v32  ;;  %v569_v60 = vld [vmem:[#allocation2 + $0x78] sm:$0xff]  ;;  %v506_v0 = vld [vmem:[%s1239_s4 + $0x160] sm:$0xff]  ;;  %v570_v6 = vld [vmem:[#allocation2 + $0x70] sm:$0xff]  ;;  %v632_v13 = vadd.f32 %v568_v40, %v504_v34 }
  0x9d   : > { %681 = vst [vmem:[%s1245_s26 + $0xd8] sm:$0xff] %v617_v36  ;;  %v507_v14 = vld [vmem:[%s1239_s4 + $0x168] sm:$0xff]  ;;  %v571_v15 = vld [vmem:[#allocation2 + $0x90] sm:$0xff]  ;;  %v633_v16 = vadd.f32 %v569_v60, %v505_v56  ;;  %v572_v19 = vld [vmem:[#allocation2 + $0x1d8] sm:$0xff]  ;;  %v634_v20 = vadd.f32 %v570_v6, %v506_v0 }
  0x9e   : > { %682 = vst [vmem:[%s1245_s26 + $0xe0] sm:$0xff] %v618_v38  ;;  %v508_v17 = vld [vmem:[%s1239_s4 + $0x170] sm:$0xff]  ;;  %v509_v1 = vld [vmem:[%s1239_s4 + $0x178] sm:$0xff]  ;;  %v635_v22 = vadd.f32 %v571_v15, %v507_v14  ;;  %v510_v2 = vld [vmem:[%s1239_s4 + $0x180] sm:$0xff] }
  0x9f   : > { %683 = vst [vmem:[%s1245_s26 + $0xe8] sm:$0xff] %v619_v42  ;;  %v573_v21 = vld [vmem:[#allocation2 + $0xd0] sm:$0xff]  ;;  %v574_v24 = vld [vmem:[#allocation2 + $0xb8] sm:$0xff]  ;;  %v636_v25 = vadd.f32 %v572_v19, %v508_v17  ;;  %v511_v26 = vld [vmem:[%s1239_s4 + $0x188] sm:$0xff] }
  0xa0   : > { %684 = vst [vmem:[%s1245_s26 + $0xf0] sm:$0xff] %v620_v45  ;;  %v575_v28 = vld [vmem:[#allocation2 + $0x88] sm:$0xff]  ;;  %v637_v29 = vadd.f32 %v573_v21, %v509_v1  ;;  %v512_v32 = vld [vmem:[%s1239_s4 + $0x190] sm:$0xff]  ;;  %v638_v35 = vadd.f32 %v574_v24, %v510_v2  ;;  %v513_v36 = vld [vmem:[%s1239_s4 + $0x198] sm:$0xff] }
  0xa1   : > { %685 = vst [vmem:[%s1245_s26 + $0xf8] sm:$0xff] %v621_v48  ;;  %v576_v33 = vld [vmem:[#allocation2 + $0xa8] sm:$0xff]  ;;  %v639_v37 = vadd.f32 %v575_v28, %v511_v26  ;;  %v514_v38 = vld [vmem:[%s1239_s4 + $0x1a0] sm:$0xff]  ;;  %v578_v39 = vld [vmem:[#allocation2 + $0x170] sm:$0xff] }
  0xa2   : > { %686 = vst [vmem:[%s1245_s26 + $0x100] sm:$0xff] %v622_v52  ;;  %v577_v12 = vld [vmem:[#allocation2 + $0x1c8] sm:$0xff]  ;;  %v640_v41 = vadd.f32 %v576_v33, %v512_v32  ;;  %v579_v43 = vld [vmem:[#allocation2 + $0x178] sm:$0xff]  ;;  %v516_v45 = vld [vmem:[%s1239_s4 + $0x1b0] sm:$0xff]  ;;  %v642_v47 = vadd.f32 %v578_v39, %v514_v38 }
  0xa3   : > { %687 = vst [vmem:[%s1245_s26 + $0x108] sm:$0xff] %v623_v55  ;;  %v515_v42 = vld [vmem:[%s1239_s4 + $0x1a8] sm:$0xff]  ;;  %v641_v44 = vadd.f32 %v577_v12, %v513_v36  ;;  %v517_v48 = vld [vmem:[%s1239_s4 + $0x1b8] sm:$0xff]  ;;  %v581_v49 = vld [vmem:[#allocation2 + $0x190] sm:$0xff] }
  0xa4   : > { %688 = vst [vmem:[%s1245_s26 + $0x110] sm:$0xff] %v624_v59  ;;  %v580_v46 = vld [vmem:[#allocation2 + $0x68] sm:$0xff]  ;;  %v643_v50 = vadd.f32 %v579_v43, %v515_v42  ;;  %v518_v52 = vld [vmem:[%s1239_s4 + $0x1c0] sm:$0xff]  ;;  %v582_v53 = vld [vmem:[#allocation2 + $0x198] sm:$0xff]  ;;  %v645_v58 = vadd.f32 %v581_v49, %v517_v48 }
  0xa5   : > { %689 = vst [vmem:[%s1245_s26 + $0x118] sm:$0xff] %v625_v3  ;;  %v644_v54 = vadd.f32 %v580_v46, %v516_v45  ;;  %v519_v55 = vld [vmem:[%s1239_s4 + $0x1c8] sm:$0xff]  ;;  %v583_v57 = vld [vmem:[#allocation2 + $0x38] sm:$0xff]  ;;  %v520_v59 = vld [vmem:[%s1239_s4 + $0x1d0] sm:$0xff]  ;;  %v646_v62 = vadd.f32 %v582_v53, %v518_v52 }
  0xa6   : > { %690 = vst [vmem:[%s1245_s26 + $0x120] sm:$0xff] %v626_v7  ;;  %v584_v61 = vld [vmem:[#allocation2 + $0xc0] sm:$0xff]  ;;  %v521_v3 = vld [vmem:[%s1239_s4 + $0x1d8] sm:$0xff]  ;;  %v647_v5 = vadd.f32 %v583_v57, %v519_v55  ;;  %v587_v11 = vld [vmem:[#allocation2 + $0x10] sm:$0xff] }
  0xa7   : > { %691 = vst [vmem:[%s1245_s26 + $0x128] sm:$0xff] %v627_v10  ;;  %v585_v4 = vld [vmem:[#allocation2 + $0x1c0] sm:$0xff]  ;;  %v586_v8 = vld [vmem:[#allocation2 + $0x158] sm:$0xff]  ;;  %v648_v9 = vadd.f32 %v584_v61, %v520_v59  ;;  %v523_v10 = vld [vmem:[%s1239_s4 + $0x1e8] sm:$0xff] }
  0xa8   : > { %692 = vst [vmem:[%s1245_s26 + $0x130] sm:$0xff] %v628_v23  ;;  %v522_v7 = vld [vmem:[%s1239_s4 + $0x1e0] sm:$0xff]  ;;  %v649_v18 = vadd.f32 %v585_v4, %v521_v3  ;;  %v524_v23 = vld [vmem:[%s1239_s4 + $0x1f0] sm:$0xff]  ;;  %v588_v27 = vld [vmem:[#allocation2 + $0x58] sm:$0xff]  ;;  %v651_v40 = vadd.f32 %v587_v11, %v523_v10 }
  0xa9   : > { %693 = vst [vmem:[%s1245_s26 + $0x138] sm:$0xff] %v629_v31  ;;  %v650_v30 = vadd.f32 %v586_v8, %v522_v7  ;;  %v525_v31 = vld [vmem:[%s1239_s4 + $0x1f8] sm:$0xff]  ;;  %v589_v34 = vld [vmem:[#allocation2 + $0xa0] sm:$0xff] }
  0xaa   : > { %694 = vst [vmem:[%s1245_s26 + $0x140] sm:$0xff] %v630_v51  ;;  %v652_v51 = vadd.f32 %v588_v27, %v524_v23  ;;  %v653_v56 = vadd.f32 %v589_v34, %v525_v31 }
  0xab   : > { %695 = vst [vmem:[%s1245_s26 + $0x148] sm:$0xff] %v631_v63 }
  0xac   : > { %696 = vst [vmem:[%s1245_s26 + $0x150] sm:$0xff] %v632_v13 }
  0xad   : > { %697 = vst [vmem:[%s1245_s26 + $0x158] sm:$0xff] %v633_v16 }
  0xae   : > { %698 = vst [vmem:[%s1245_s26 + $0x160] sm:$0xff] %v634_v20 }
  0xaf   : > { %699 = vst [vmem:[%s1245_s26 + $0x168] sm:$0xff] %v635_v22 }
  0xb0   : > { %700 = vst [vmem:[%s1245_s26 + $0x170] sm:$0xff] %v636_v25 }
  0xb1   : > { %701 = vst [vmem:[%s1245_s26 + $0x178] sm:$0xff] %v637_v29 }
  0xb2   : > { %702 = vst [vmem:[%s1245_s26 + $0x180] sm:$0xff] %v638_v35 }
  0xb3   : > { %703 = vst [vmem:[%s1245_s26 + $0x188] sm:$0xff] %v639_v37 }
  0xb4   : > { %704 = vst [vmem:[%s1245_s26 + $0x190] sm:$0xff] %v640_v41 }
  0xb5   : > { %705 = vst [vmem:[%s1245_s26 + $0x198] sm:$0xff] %v641_v44 }
  0xb6   : > { %706 = vst [vmem:[%s1245_s26 + $0x1a0] sm:$0xff] %v642_v47 }
  0xb7   : > { %707 = vst [vmem:[%s1245_s26 + $0x1a8] sm:$0xff] %v643_v50 }
  0xb8   : > { %708 = vst [vmem:[%s1245_s26 + $0x1b0] sm:$0xff] %v644_v54 }
  0xb9   : > { %709 = vst [vmem:[%s1245_s26 + $0x1b8] sm:$0xff] %v645_v58 }
  0xba   : > { %710 = vst [vmem:[%s1245_s26 + $0x1c0] sm:$0xff] %v646_v62 }
  0xbb   : > { %711 = vst [vmem:[%s1245_s26 + $0x1c8] sm:$0xff] %v647_v5 }
  0xbc   : > { %712 = vst [vmem:[%s1245_s26 + $0x1d0] sm:$0xff] %v648_v9 }
  0xbd   : > { %713 = vst [vmem:[%s1245_s26 + $0x1d8] sm:$0xff] %v649_v18 }
  0xbe   : > { %714 = vst [vmem:[%s1245_s26 + $0x1e0] sm:$0xff] %v650_v30 }
  0xbf   : > { %715 = vst [vmem:[%s1245_s26 + $0x1e8] sm:$0xff] %v651_v40 }
  0xc0   : > { %716 = vst [vmem:[%s1245_s26 + $0x1f0] sm:$0xff] %v652_v51 }
  0xc1   : > { %717 = vst [vmem:[%s1245_s26 + $0x1f8] sm:$0xff] %v653_v56 }
  0xc2   : > { %1049 = shalt.err (!%p1046_p2)
}
  0xc3   : > { %s1113_s17 = smov 128   ;;  %s1114_s26 = smov 8  }
  0xc4   : > { %906 = dma.vmem_to_hbm [thread:$0]  (%p1182_p8), %s737_s15, 8192, %s739_s16, %s719_s23, %s1113_s17, %s1113_s17, %s1114_s26  }
  0xc5 PF: > { %s753_s20 = sand.u32 1, %s1088_s9   ;;  %p917_p4 = pnand %p849_p13, %p1186_p9 }
  0xc6   : > { %s754_s27 = scalar_lea.sflag [#allocation5], %s753_s20 }
  0xc7   : > { %p918_p6 = pneg %p917_p4 }
  0xc9   : > { %1083 = dma.done.wait (%p918_p6), %s754_s27, 8192  }
  0xca   : > { %1085 = vsyncadd (%p918_p6), %s754_s27, 4294959104  ;;  %s19_s14 = sadd.s32 1, %s1108_s14   ;;  %s1578_s9 = smov %s1092_s10 }
  0xcb   : > { %p16_p10 = scmp.ge.s32.totalorder %s19_s14, 4   ;;  %s1579_s10 = smov %s1096_s11 }
  0xcc   : > { %s1580_s11 = smov %s1224_s19  ;;  %s1581_s12 = smov %s1104_s13 }
  0xcd   : > { %s1582_s13 = smov %s1584_s28  ;;  %18 = sbr.rel (!%p16_p10) target bundleno = 7 (0x7), region = 85 }
  0xd2   :  { %760 = vsyncpa [#allocation4], 1 }
  0xd3   :  { %762 = vsyncpa [#allocation4 + $0x1], 1 }
  0xd4   :  { %763 = vsyncpa [#allocation5], 1 }
  0xd5   :  { %765 = vsyncpa [#allocation5 + $0x1], 1 }
  0xd6   :  { %766 = vsyncpa [#allocation6], 1 }
  0xd7   :  { %768 = vsyncpa [#allocation6 + $0x1], 1 }

</bundles_post_ra>
